<compile_context>
chip_gen: v7x
topology: tpu7x:2x2x1
jax: 0.10.0
libtpu: 0.0.40
codegen_flags: <defaults>
</compile_context>

<pallas_src>
import jax
import jax.numpy as jnp
from jax.experimental import pallas as pl
from jax.experimental.pallas import tpu as pltpu

LANE = 128            # vreg lane width
TILE_BYTES = 1 << 20  # ~1 MiB per input block (x2 inputs x2 buffers = 4 MiB VMEM)
NUM_CORES = 2         # per-core partial sums (both TCs on v7x; harmless on 1-TC chips)


def _round_up(x, m):
    return ((x + m - 1) // m) * m


def _make_sq_diff_kernel(tile_r, valid_rows, blocks_per_core):
    def kernel(o_ref, t_ref, out_ref, acc_ref):
        c = pl.program_id(0)   # core-split axis  ("parallel")
        i = pl.program_id(1)   # reduction axis   ("arbitrary")

        @pl.when(i == 0)
        def _():
            acc_ref[...] = jnp.zeros_like(acc_ref)

        d = o_ref[...].astype(jnp.float32) - t_ref[...].astype(jnp.float32)
        sq = d * d

        logical_block = c * blocks_per_core + i
        is_full = (logical_block + 1) * tile_r <= valid_rows

        # Hot path: full block, no masking ops.
        @pl.when(is_full)
        def _():
            acc_ref[...] += jnp.sum(sq, axis=0, keepdims=True)

        # Cold path: ragged tail block (or idle-core filler) -> mask rows past
        # the logical end.
        @pl.when(jnp.logical_not(is_full))
        def _():
            row_ids = logical_block * tile_r + jax.lax.broadcasted_iota(
                jnp.int32, sq.shape, 0)
            sq_masked = jnp.where(row_ids < valid_rows, sq, 0.0)
            acc_ref[...] += jnp.sum(sq_masked, axis=0, keepdims=True)

        # Finalize: one cross-lane reduce + scalar SMEM store per core.
        @pl.when(i == pl.num_programs(1) - 1)
        def _():
            out_ref[0, 0] = jnp.sum(acc_ref[...])

    return kernel


def psnr_loss(outputs, targets, max_val=1.0):
    assert outputs.shape == targets.shape
    n = outputs.size
    of = outputs.reshape(-1)
    tf = targets.reshape(-1)

    # Only pad the sub-lane tail (<128 elems); identical zero pads cancel in the diff.
    # TODO(synk): when n % 128 != 0 this pad materializes a copy of the flattened
    # tensors; typical NCHW image tensors hit the zero-pad fast path.
    lane_pad = (-n) % LANE
    if lane_pad:
        of = jnp.pad(of, (0, lane_pad))
        tf = jnp.pad(tf, (0, lane_pad))

    rows = (n + lane_pad) // LANE
    o2 = of.reshape(rows, LANE)
    t2 = tf.reshape(rows, LANE)

    itemsize = jnp.dtype(outputs.dtype).itemsize
    # ~1 MiB block per input; multiple of 16 rows keeps the block legal for
    # both f32 and bf16 inputs.
    tile_r_max = max(TILE_BYTES // (LANE * itemsize), 16)
    tile_r = min(tile_r_max, _round_up(rows, 16))
    num_blocks = pl.cdiv(rows, tile_r)
    num_cores = min(NUM_CORES, num_blocks)
    blocks_per_core = pl.cdiv(num_blocks, num_cores)

    def in_map(c, i):
        # Clamp the DMA'd block in-bounds; out-of-range work is masked in-kernel.
        return (jnp.minimum(c * blocks_per_core + i, num_blocks - 1), 0)

    partials = pl.pallas_call(
        _make_sq_diff_kernel(tile_r, rows, blocks_per_core),
        out_shape=jax.ShapeDtypeStruct((num_cores, 1), jnp.float32),
        grid_spec=pltpu.PrefetchScalarGridSpec(
            num_scalar_prefetch=0,
            grid=(num_cores, blocks_per_core),
            in_specs=[
                pl.BlockSpec((tile_r, LANE), in_map),
                pl.BlockSpec((tile_r, LANE), in_map),
            ],
            out_specs=pl.BlockSpec((1, 1), lambda c, i: (c, 0),
                                   memory_space=pltpu.SMEM),
            scratch_shapes=[pltpu.VMEM((1, LANE), jnp.float32)],
        ),
        compiler_params=pltpu.CompilerParams(
            dimension_semantics=("parallel", "arbitrary")),
        cost_estimate=pl.CostEstimate(
            flops=3 * n, transcendentals=0,
            bytes_accessed=2 * n * itemsize + 4 * num_cores),
    )(o2, t2)

    sq_sum = jnp.sum(partials)
    mse = sq_sum / jnp.float32(n)
    psnr = 10.0 * jnp.log10(jnp.float32(max_val) ** 2 / mse)
    # torch returns +inf (not -psnr) when mse == 0
    return jnp.where(mse == 0, jnp.inf, -psnr)


if __name__ == "__main__":
    key = jax.random.PRNGKey(0)
    k1, k2 = jax.random.split(key)
    # NCHW, matching the PyTorch convention
    outputs = jax.random.uniform(k1, (2, 4, 16, 16), dtype=jnp.float32)
    targets = jax.random.uniform(k2, (2, 4, 16, 16), dtype=jnp.float32)

    loss_fn = jax.jit(psnr_loss)

    loss = loss_fn(outputs, targets)
    jax.block_until_ready(loss)

    # pure-JAX reference check
    mse_ref = jnp.mean((outputs - targets) ** 2)
    ref = jnp.where(mse_ref == 0, jnp.inf, -10.0 * jnp.log10(1.0 / mse_ref))
    assert jnp.allclose(loss, ref, rtol=1e-5, atol=1e-5), (loss, ref)

    # also exercise the identical-input (mse == 0 -> +inf) branch
    loss_same = loss_fn(outputs, outputs)
    jax.block_until_ready(loss_same)
    assert jnp.isinf(loss_same), loss_same

    print("KERNEL_OK")
</pallas_src>

<mosaic_0001>
module attributes {stable_mosaic.version = 11 : i64} {
  func.func @kernel(%arg0: i32, %arg1: i32, %arg2: memref<16x128xf32, #tpu.memory_space<vmem>>, %arg3: memref<16x128xf32, #tpu.memory_space<vmem>>, %arg4: memref<1x1xf32, #tpu.memory_space<smem>>, %arg5: memref<1x128xf32, #tpu.memory_space<vmem>>) attributes {dimension_semantics = [#tpu.dimension_semantics<parallel>, #tpu.dimension_semantics<arbitrary>], iteration_bounds = array<i64: 1, 1>, scalar_prefetch = 0 : i64, scratch_operands = 1 : i64, tpu.core_type = #tpu.core_type<tc>, window_params = [{transform_indices = @transform_0, window_bounds = array<i64: 16, 128>}, {transform_indices = @transform_1, window_bounds = array<i64: 16, 128>}, {transform_indices = @transform_2, window_bounds = array<i64: 1, 1>}]} {
    %c0_i32 = arith.constant 0 : i32
    %0 = arith.cmpi eq, %arg1, %c0_i32 : i32
    %1 = arith.extui %0 : i1 to i32
    %c0_i32_0 = arith.constant 0 : i32
    %2 = arith.cmpi ne, %1, %c0_i32_0 : i32
    scf.if %2 {
      %cst = arith.constant 0.000000e+00 : f32
      %20 = vector.broadcast %cst : f32 to vector<1x128xf32>
      %c0_10 = arith.constant 0 : index
      %c0_11 = arith.constant 0 : index
      %21 = vector.load %arg5[%c0_10, %c0_11] : memref<1x128xf32, #tpu.memory_space<vmem>>, vector<1x128xf32>
      tpu.vector_store %arg5[%c0_10, %c0_11], %20 {strides = array<i32>} : memref<1x128xf32, #tpu.memory_space<vmem>>, vector<1x128xf32>,
    } else {
    }
    %c0 = arith.constant 0 : index
    %c0_1 = arith.constant 0 : index
    %3 = vector.load %arg2[%c0, %c0_1] : memref<16x128xf32, #tpu.memory_space<vmem>>, vector<16x128xf32>
    %c0_2 = arith.constant 0 : index
    %c0_3 = arith.constant 0 : index
    %4 = vector.load %arg3[%c0_2, %c0_3] : memref<16x128xf32, #tpu.memory_space<vmem>>, vector<16x128xf32>
    %5 = arith.subf %3, %4 : vector<16x128xf32>
    %6 = arith.mulf %5, %5 : vector<16x128xf32>
    %c1_i32 = arith.constant 1 : i32
    %7 = arith.muli %arg0, %c1_i32 : i32
    %8 = arith.addi %7, %arg1 : i32
    %c1_i32_4 = arith.constant 1 : i32
    %9 = arith.addi %8, %c1_i32_4 : i32
    %c16_i32 = arith.constant 16 : i32
    %10 = arith.muli %9, %c16_i32 : i32
    %c16_i32_5 = arith.constant 16 : i32
    %11 = arith.cmpi sle, %10, %c16_i32_5 : i32
    %12 = arith.extui %11 : i1 to i32
    %c0_i32_6 = arith.constant 0 : i32
    %13 = arith.cmpi ne, %12, %c0_i32_6 : i32
    scf.if %13 {
      %c0_10 = arith.constant 0 : index
      %c0_11 = arith.constant 0 : index
      %20 = vector.load %arg5[%c0_10, %c0_11] : memref<1x128xf32, #tpu.memory_space<vmem>>, vector<1x128xf32>
      %cst = arith.constant dense<0.000000e+00> : vector<128xf32>
      %21 = vector.multi_reduction <add>, %6, %cst [0] : vector<16x128xf32> to vector<128xf32>
      %22 = vector.shape_cast %21 : vector<128xf32> to vector<1x128xf32>
      %23 = arith.addf %20, %22 : vector<1x128xf32>
      %c0_12 = arith.constant 0 : index
      %c0_13 = arith.constant 0 : index
      %24 = vector.load %arg5[%c0_12, %c0_13] : memref<1x128xf32, #tpu.memory_space<vmem>>, vector<1x128xf32>
      tpu.vector_store %arg5[%c0_12, %c0_13], %23 {strides = array<i32>} : memref<1x128xf32, #tpu.memory_space<vmem>>, vector<1x128xf32>,
    } else {
    }
    %true = arith.constant true
    %14 = arith.xori %11, %true : i1
    %15 = arith.extui %14 : i1 to i32
    %c0_i32_7 = arith.constant 0 : i32
    %16 = arith.cmpi ne, %15, %c0_i32_7 : i32
    scf.if %16 {
      %c16_i32_10 = arith.constant 16 : i32
      %20 = arith.muli %8, %c16_i32_10 : i32
      %21 = tpu.iota {dimensions = array<i32: 0>} : vector<16x128xi32>
      %22 = vector.broadcast %20 : i32 to vector<16x128xi32>
      %23 = arith.addi %22, %21 : vector<16x128xi32>
      %c16_i32_11 = arith.constant 16 : i32
      %24 = vector.broadcast %c16_i32_11 : i32 to vector<16x128xi32>
      %25 = arith.cmpi slt, %23, %24 : vector<16x128xi32>
      %cst = arith.constant 0.000000e+00 : f32
      %26 = vector.broadcast %cst : f32 to vector<16x128xf32>
      %27 = arith.select %25, %6, %26 : vector<16x128xi1>, vector<16x128xf32>
      %c0_12 = arith.constant 0 : index
      %c0_13 = arith.constant 0 : index
      %28 = vector.load %arg5[%c0_12, %c0_13] : memref<1x128xf32, #tpu.memory_space<vmem>>, vector<1x128xf32>
      %cst_14 = arith.constant dense<0.000000e+00> : vector<128xf32>
      %29 = vector.multi_reduction <add>, %27, %cst_14 [0] : vector<16x128xf32> to vector<128xf32>
      %30 = vector.shape_cast %29 : vector<128xf32> to vector<1x128xf32>
      %31 = arith.addf %28, %30 : vector<1x128xf32>
      %c0_15 = arith.constant 0 : index
      %c0_16 = arith.constant 0 : index
      %32 = vector.load %arg5[%c0_15, %c0_16] : memref<1x128xf32, #tpu.memory_space<vmem>>, vector<1x128xf32>
      tpu.vector_store %arg5[%c0_15, %c0_16], %31 {strides = array<i32>} : memref<1x128xf32, #tpu.memory_space<vmem>>, vector<1x128xf32>,
    } else {
    }
    %c0_i32_8 = arith.constant 0 : i32
    %17 = arith.cmpi eq, %arg1, %c0_i32_8 : i32
    %18 = arith.extui %17 : i1 to i32
    %c0_i32_9 = arith.constant 0 : i32
    %19 = arith.cmpi ne, %18, %c0_i32_9 : i32
    scf.if %19 {
      %c0_10 = arith.constant 0 : index
      %c0_11 = arith.constant 0 : index
      %20 = vector.load %arg5[%c0_10, %c0_11] : memref<1x128xf32, #tpu.memory_space<vmem>>, vector<1x128xf32>
      %21 = vector.shape_cast %20 : vector<1x128xf32> to vector<1x1x128xf32>
      %cst = arith.constant dense<0.000000e+00> : vector<1xf32>
      %22 = vector.multi_reduction <add>, %21, %cst [1, 2] : vector<1x1x128xf32> to vector<1xf32>
      %23 = vector.shape_cast %22 : vector<1xf32> to vector<1x1x1xf32>
      %24 = vector.extract %23[0, 0, 0] : f32 from vector<1x1x1xf32>
      %c0_12 = arith.constant 0 : index
      %c0_13 = arith.constant 0 : index
      %25 = memref.load %arg4[%c0_12, %c0_13] : memref<1x1xf32, #tpu.memory_space<smem>>
      memref.store %24, %arg4[%c0_12, %c0_13] : memref<1x1xf32, #tpu.memory_space<smem>>
    } else {
    }
    return
  }
  func.func @transform_0(%arg0: i32, %arg1: i32) -> (i32, i32) {
    %c1_i32 = arith.constant 1 : i32
    %0 = arith.muli %arg0, %c1_i32 : i32
    %1 = arith.addi %0, %arg1 : i32
    %c0_i32 = arith.constant 0 : i32
    %2 = arith.minsi %1, %c0_i32 : i32
    %c0_i32_0 = arith.constant 0 : i32
    %c0_i32_1 = arith.constant 0 : i32
    return %2, %c0_i32_0 : i32, i32
  }
  func.func @transform_1(%arg0: i32, %arg1: i32) -> (i32, i32) {
    %c1_i32 = arith.constant 1 : i32
    %0 = arith.muli %arg0, %c1_i32 : i32
    %1 = arith.addi %0, %arg1 : i32
    %c0_i32 = arith.constant 0 : i32
    %2 = arith.minsi %1, %c0_i32 : i32
    %c0_i32_0 = arith.constant 0 : i32
    %c0_i32_1 = arith.constant 0 : i32
    return %2, %c0_i32_0 : i32, i32
  }
  func.func @transform_2(%arg0: i32, %arg1: i32) -> (i32, i32) {
    %c0_i32 = arith.constant 0 : i32
    %c0_i32_0 = arith.constant 0 : i32
    return %arg0, %c0_i32 : i32, i32
  }
}

</mosaic_0001>

<bundles_post_ra>
// kernel: psnr_loss.1
= control target key start
LH: loop header
LB: loop body
LE: loop exit
PB: predicated region body
PF: predicated region fallthrough
CT: control target
= control target key end

     0   :  { %v189_v3 = vmov 0.0   ;;  %s230_s0 = inlined_call_operand.vmem [shape: f32[16,128], index: 0, kind: input, shape index: {}]   ;;  %s231_s1 = inlined_call_operand.vmem [shape: f32[16,128], index: 1, kind: input, shape index: {}]   ;;  %s232_s2 = inlined_call_operand.hbm [shape: f32[1,1], index: 2, kind: output, shape index: {}]  }
   0x1   :  { %v81_v0 = vld [vmem:[%s230_s0] sm:$0xff]  ;;  %v82_v1 = vld [vmem:[%s230_s0 + $0x8] sm:$0xff]  ;;  %80 = vst [vmem:[#allocation2] sm:$0x1] %v189_v3 }
   0x2   :  { %v83_v2 = vld [vmem:[%s231_s1] sm:$0xff]  ;;  %v84_v4 = vld [vmem:[%s231_s1 + $0x8] sm:$0xff] }
   0x3   :  { %v85_v5 = vsub.f32 %v81_v0, %v83_v2 }
   0x4   :  { %7 = vsyncpa [#allocation4], 0  ;;  %v86_v6 = vsub.f32 %v82_v1, %v84_v4  ;;  %vm135_vm0 = vcmask 1040384   ;;  %s177_s18 = scalar_lea.hbm %s232_s2, 16 }
   0x5   :  { %v87_v7 = vmul.f32 %v85_v5, %v85_v5  ;;  %p178_p0 = scmp.ne.s32.totalorder %s232_s2, %s177_s18  ;;  %p181_p1 = scmp.lt.u32.totalorder %s177_s18, %s232_s2 }
   0x6   :  { %v88_v8 = vmul.f32 %v86_v6, %v86_v6 }
   0x7   :  { %p183_p2 = pnand %p181_p1, %p178_p0 }
   0x8   :  { %v97_v9 = vadd.f32 %v88_v8, %v87_v7  ;;  %v96_v15 = vld [vmem:[#allocation2] sm:$0x1] }
   0xa   :  { %v98_v10 = vrot.slane %v97_v9, 4 }
   0xc   :  { %v99_v11 = vadd.f32 %v98_v10, %v97_v9 }
   0xe   :  { %v100_v12 = vrot.slane %v99_v11, 2 }
  0x10   :  { %v101_v13 = vadd.f32 %v100_v12, %v99_v11 }
  0x12   :  { %v102_v14 = vrot.slane %v101_v13, 1 }
  0x14   :  { %v103_v16 = vadd.f32 %v102_v14, %v101_v13 }
  0x16   :  { %v104_v17 = vadd.f32 %v103_v16, %v96_v15 }
  0x18   :  { %105 = vst [vmem:[#allocation2] sm:$0x1] %v104_v17 }
  0x1f   :  { %v134_v18 = vld [vmem:[#allocation2] sm:$0x1] }
  0x20   :  { %v136_v19 = vsel %vm135_vm0, %v134_v18, 0.0 }
  0x21   :  { %137 = vadd.xlane.f32.xlu0 %v136_v19 }
  0xae   :  { %v138_v20 = vpop.xlane.xlu0 %137 }
  0xaf   :  { %v139_v21 = vrot.slane %v138_v20, 4 }
  0xb1   :  { %v140_v22 = vadd.f32 %v139_v21, %v138_v20 }
  0xb3   :  { %v141_v23 = vrot.slane %v140_v22, 2 }
  0xb5   :  { %v142_v24 = vadd.f32 %v141_v23, %v140_v22 }
  0xb7   :  { %v143_v25 = vrot.slane %v142_v24, 1 }
  0xb9   :  { %v144_v26 = vadd.f32 %v143_v25, %v142_v24 }
  0xbb   :  { %173 = vpush %v144_v26 }
  0xec   :  { %s174_s0 = spop %173 }
  0xed   :  { %147 = sst [smem:[#allocation3]] %s174_s0 }
  0xee   :  { %186 = shalt.err (!%p183_p2)
}
  0xef   :  { %s190_s23 = smov [#allocation3]  }
  0xf0   :  { %155 = dma.smem_to_hbm %s190_s23, 16, %s232_s2, [#allocation4]  }
  0xf1   :  { %187 = dma.done.wait [#allocation4], 16  }
  0xf2   :  { %188 = vsyncadd [#allocation4], 4294967280 }
  0xf3   :  { %159 = sfence }
  0xf4   :  { %160 = vsyncpa [#allocation4], 1 }

</bundles_post_ra>
